<compile_context>
chip_gen: v5e
topology: v5e:2x2
jax: 0.10.0
libtpu: 0.0.40
codegen_flags: <defaults>
</compile_context>

<pallas_src>
import functools
import math

import jax
import jax.numpy as jnp
from jax.experimental import pallas as pl
from jax.experimental.pallas import tpu as pltpu


def _noisy_linear_kernel(x_ref, ein_ref, wmu_ref, wsig_ref, eout_ref, beff_ref,
                         o_ref, acc_mu_ref, acc_sig_ref, *, tk):
    """One (OUT-tile j, K-tile k) grid step.

    x_ref      : (B, IN)     full input, resident (constant block index)
    ein_ref    : (1, IN)     factorized noise along IN, resident
    wmu_ref    : (tk, to)    weight_mu tile   (k-major layout)
    wsig_ref   : (tk, to)    weight_sigma tile (k-major layout)
    eout_ref   : (1, to)     factorized noise along OUT (lane-dense row)
    beff_ref   : (1, to)     precomputed effective bias
    o_ref      : (B, to)     output tile (resident across the K axis)
    acc_mu_ref : (B, to) f32 accumulator for the mu matmul
    acc_sig_ref: (B, to) f32 accumulator for the sigma matmul
    """
    k = pl.program_id(1)

    @pl.when(k == 0)
    def _():
        acc_mu_ref[...] = jnp.zeros_like(acc_mu_ref)
        acc_sig_ref[...] = jnp.zeros_like(acc_sig_ref)

    off = pl.multiple_of(k * tk, tk)
    x_k = x_ref[:, pl.ds(off, tk)]            # (B, tk)
    ein_k = ein_ref[:, pl.ds(off, tk)]        # (1, tk)

    # Two canonical k-major MXU matmuls, f32 accumulation.
    acc_mu_ref[...] += jnp.dot(x_k, wmu_ref[...],
                               preferred_element_type=jnp.float32)
    acc_sig_ref[...] += jnp.dot(x_k * ein_k, wsig_ref[...],
                                preferred_element_type=jnp.float32)

    @pl.when(k == pl.num_programs(1) - 1)
    def _():
        o_ref[...] = (acc_mu_ref[...]
                      + acc_sig_ref[...] * eout_ref[...]
                      + beff_ref[...]).astype(o_ref.dtype)


def _pick_tile(dim, preferred, min_blocks=1):
    """Largest multiple of 128 <= preferred that divides `dim`.

    If min_blocks > 1 and the dimension can be split, also cap the tile so the
    grid axis has at least `min_blocks` tiles (v7x megacore sharding).
    Falls back to the full dimension when it is not a multiple of 128 (a
    full-extent block is exempt from the (8,128) tiling constraint).
    """
    if dim % 128 != 0:
        return dim
    limit = min(dim, preferred)
    if min_blocks > 1 and dim // 128 >= min_blocks:
        limit = min(limit, dim // min_blocks)
    best = 128
    t = 128
    while t <= limit:
        if dim % t == 0:
            best = t
        t += 128
    return best


def noisy_linear(x, weight_mu_t, weight_sigma_t, eps_in, eps_out,
                 bias_mu, bias_sigma, *, tile_out=512, tile_k=1024):
    """Noisy linear forward.

    x              : (B, IN)
    weight_mu_t    : (IN, OUT)  weight_mu, k-major (pre-transposed at init)
    weight_sigma_t : (IN, OUT)  weight_sigma, k-major
    eps_in         : (IN,)   factorized noise (weight_epsilon = outer(eps_out, eps_in))
    eps_out        : (OUT,)  factorized noise; also bias_epsilon
    bias_mu        : (OUT,)
    bias_sigma     : (OUT,)
    Returns (B, OUT).
    """
    B, IN = x.shape
    OUT = weight_mu_t.shape[1]

    # Tiny elementwise folds done once in plain JAX, passed lane-dense.
    b_eff = (bias_mu + bias_sigma * eps_out).reshape(1, OUT).astype(jnp.float32)
    eout_row = eps_out.reshape(1, OUT).astype(jnp.float32)
    ein_row = eps_in.reshape(1, IN).astype(x.dtype)

    to = _pick_tile(OUT, tile_out, min_blocks=2)   # >=2 tiles -> both v7x TCs
    tk = _pick_tile(IN, tile_k)
    grid = (OUT // to, IN // tk)

    # TODO(synk): for large training batches add a batch grid axis (block B to
    # 128-256) instead of keeping the full-B resident x / accumulators.

    flops = 4 * B * IN * OUT                       # two MXU matmuls
    w_item = weight_mu_t.dtype.itemsize
    bytes_accessed = (
        x.size * x.dtype.itemsize
        + 2 * OUT * IN * w_item                    # wmu + wsig (no w_eps!)
        + (IN + 2 * OUT) * 4                       # eps_in, eps_out, b_eff
        + B * OUT * x.dtype.itemsize               # output
    )

    # VMEM footprint estimate (double-buffered where applicable).
    vmem_est = (
        2 * B * IN * x.dtype.itemsize              # x (resident)
        + 2 * IN * x.dtype.itemsize                # eps_in row
        + 2 * 2 * tk * to * w_item                 # wmu + wsig, 2 buffers each
        + 2 * 2 * to * 4                           # eps_out row + b_eff row
        + 2 * B * to * x.dtype.itemsize            # output tile
        + 2 * B * to * 4                           # two f32 accumulators
    )
    vmem_limit = min(64 * 1024 * 1024,
                     max(32 * 1024 * 1024, int(1.4 * vmem_est)))

    kernel = functools.partial(_noisy_linear_kernel, tk=tk)

    return pl.pallas_call(
        kernel,
        out_shape=jax.ShapeDtypeStruct((B, OUT), x.dtype),
        grid_spec=pltpu.PrefetchScalarGridSpec(
            num_scalar_prefetch=0,
            grid=grid,
            in_specs=[
                pl.BlockSpec((B, IN),  lambda j, k: (0, 0)),   # x (resident)
                pl.BlockSpec((1, IN),  lambda j, k: (0, 0)),   # eps_in (resident)
                pl.BlockSpec((tk, to), lambda j, k: (k, j)),   # weight_mu (k-major)
                pl.BlockSpec((tk, to), lambda j, k: (k, j)),   # weight_sigma
                pl.BlockSpec((1, to),  lambda j, k: (0, j)),   # eps_out (lane-dense)
                pl.BlockSpec((1, to),  lambda j, k: (0, j)),   # b_eff
            ],
            out_specs=pl.BlockSpec((B, to), lambda j, k: (0, j)),
            scratch_shapes=[pltpu.VMEM((B, to), jnp.float32),
                            pltpu.VMEM((B, to), jnp.float32)],
        ),
        compiler_params=pltpu.CompilerParams(
            dimension_semantics=("parallel", "arbitrary"),
            vmem_limit_bytes=vmem_limit,
        ),
        cost_estimate=pl.CostEstimate(
            flops=flops, transcendentals=0, bytes_accessed=bytes_accessed),
    )(x, ein_row, weight_mu_t, weight_sigma_t, eout_row, b_eff)


def _scale_noise(key, size):
    # PyTorch: x = randn(size); x.sign() * x.abs().sqrt()
    x = jax.random.normal(key, (size,), dtype=jnp.float32)
    return jnp.sign(x) * jnp.sqrt(jnp.abs(x))


def init_noisy_linear_params(key, in_features, out_features, std_init):
    """Replicates reset_parameters() + reset_noise().

    Weights are returned k-major, shape (IN, OUT) — a one-time transpose of
    the PyTorch (OUT, IN) layout so the kernel's dot is canonical.
    Noise is kept factorized (eps_in, eps_out); eps_out is also bias_epsilon.
    """
    k_wmu, k_bmu, k_eps_in, k_eps_out = jax.random.split(key, 4)
    mu_range = 1.0 / math.sqrt(in_features)

    weight_mu = jax.random.uniform(
        k_wmu, (out_features, in_features), jnp.float32, -mu_range, mu_range)
    weight_sigma = jnp.full((out_features, in_features),
                            std_init / math.sqrt(in_features), jnp.float32)
    bias_mu = jax.random.uniform(
        k_bmu, (out_features,), jnp.float32, -mu_range, mu_range)
    bias_sigma = jnp.full((out_features,),
                          std_init / math.sqrt(out_features), jnp.float32)

    eps_in = _scale_noise(k_eps_in, in_features)
    eps_out = _scale_noise(k_eps_out, out_features)

    # One-time k-major transpose (parameters).
    weight_mu_t = weight_mu.T
    weight_sigma_t = weight_sigma.T

    return (weight_mu_t, weight_sigma_t, eps_in, eps_out, bias_mu, bias_sigma)


if __name__ == "__main__":
    B, IN, OUT = 8, 256, 256          # small; still exercises a 2x1 grid
    STD_INIT = 0.5

    key = jax.random.PRNGKey(0)
    k_params, k_x = jax.random.split(key)

    (w_mu_t, w_sig_t, eps_in, eps_out,
     b_mu, b_sig) = init_noisy_linear_params(k_params, IN, OUT, STD_INIT)
    x = jax.random.normal(k_x, (B, IN), dtype=jnp.float32)

    out = noisy_linear(x, w_mu_t, w_sig_t, eps_in, eps_out, b_mu, b_sig,
                       tile_out=128, tile_k=128)
    out = jax.block_until_ready(out)

    # Pure-JAX reference in the exact PyTorch layout / formulation:
    # fully-materialized weight_epsilon, F.linear on the noisy parameters.
    w_mu = w_mu_t.T                               # (OUT, IN)
    w_sig = w_sig_t.T                             # (OUT, IN)
    w_eps = jnp.outer(eps_out, eps_in)            # (OUT, IN)
    b_eps = eps_out
    ref = x @ (w_mu + w_sig * w_eps).T + (b_mu + b_sig * b_eps)

    assert out.shape == (B, OUT)
    assert jnp.allclose(out, ref, atol=2e-4, rtol=2e-4)

    print("KERNEL_OK")
</pallas_src>

<mosaic_0001>
module attributes {stable_mosaic.version = 11 : i64} {
  func.func @_noisy_linear_kernel(%arg0: i32, %arg1: i32, %arg2: memref<8x256xf32, #tpu.memory_space<vmem>>, %arg3: memref<1x256xf32, #tpu.memory_space<vmem>>, %arg4: memref<128x128xf32, #tpu.memory_space<vmem>>, %arg5: memref<128x128xf32, #tpu.memory_space<vmem>>, %arg6: memref<1x128xf32, #tpu.memory_space<vmem>>, %arg7: memref<1x128xf32, #tpu.memory_space<vmem>>, %arg8: memref<8x128xf32, #tpu.memory_space<vmem>>, %arg9: memref<8x128xf32, #tpu.memory_space<vmem>>, %arg10: memref<8x128xf32, #tpu.memory_space<vmem>>) attributes {dimension_semantics = [#tpu.dimension_semantics<parallel>, #tpu.dimension_semantics<arbitrary>], iteration_bounds = array<i64: 2, 2>, scalar_prefetch = 0 : i64, scratch_operands = 2 : i64, tpu.core_type = #tpu.core_type<tc>, window_params = [{pipeline_mode = #tpu.pipeline_mode<synchronous>, transform_indices = @transform_0, window_bounds = array<i64: 8, 256>}, {pipeline_mode = #tpu.pipeline_mode<synchronous>, transform_indices = @transform_1, window_bounds = array<i64: 1, 256>}, {transform_indices = @transform_2, window_bounds = array<i64: 128, 128>}, {transform_indices = @transform_3, window_bounds = array<i64: 128, 128>}, {transform_indices = @transform_4, window_bounds = array<i64: 1, 128>}, {transform_indices = @transform_5, window_bounds = array<i64: 1, 128>}, {transform_indices = @transform_6, window_bounds = array<i64: 8, 128>}]} {
    %c0_i32 = arith.constant 0 : i32
    %0 = arith.cmpi eq, %arg1, %c0_i32 : i32
    %1 = arith.extui %0 : i1 to i32
    %c0_i32_0 = arith.constant 0 : i32
    %2 = arith.cmpi ne, %1, %c0_i32_0 : i32
    scf.if %2 {
      %cst_16 = arith.constant 0.000000e+00 : f32
      %24 = vector.broadcast %cst_16 : f32 to vector<8x128xf32>
      %c0_17 = arith.constant 0 : index
      %c0_18 = arith.constant 0 : index
      %25 = vector.load %arg9[%c0_17, %c0_18] : memref<8x128xf32, #tpu.memory_space<vmem>>, vector<8x128xf32>
      tpu.vector_store %arg9[%c0_17, %c0_18], %24 {strides = array<i32>} : memref<8x128xf32, #tpu.memory_space<vmem>>, vector<8x128xf32>,
      %cst_19 = arith.constant 0.000000e+00 : f32
      %26 = vector.broadcast %cst_19 : f32 to vector<8x128xf32>
      %c0_20 = arith.constant 0 : index
      %c0_21 = arith.constant 0 : index
      %27 = vector.load %arg10[%c0_20, %c0_21] : memref<8x128xf32, #tpu.memory_space<vmem>>, vector<8x128xf32>
      tpu.vector_store %arg10[%c0_20, %c0_21], %26 {strides = array<i32>} : memref<8x128xf32, #tpu.memory_space<vmem>>, vector<8x128xf32>,
    } else {
    }
    %c128_i32 = arith.constant 128 : i32
    %3 = arith.muli %arg1, %c128_i32 : i32
    %4 = tpu.assume_multiple %3, 128 : i32
    %c0 = arith.constant 0 : index
    %5 = arith.index_cast %4 : i32 to index
    %6 = vector.load %arg2[%c0, %5] : memref<8x256xf32, #tpu.memory_space<vmem>>, vector<8x128xf32>
    %c0_1 = arith.constant 0 : index
    %7 = arith.index_cast %4 : i32 to index
    %8 = vector.load %arg3[%c0_1, %7] : memref<1x256xf32, #tpu.memory_space<vmem>>, vector<1x128xf32>
    %c0_2 = arith.constant 0 : index
    %c0_3 = arith.constant 0 : index
    %9 = vector.load %arg9[%c0_2, %c0_3] : memref<8x128xf32, #tpu.memory_space<vmem>>, vector<8x128xf32>
    %c0_4 = arith.constant 0 : index
    %c0_5 = arith.constant 0 : index
    %10 = vector.load %arg4[%c0_4, %c0_5] : memref<128x128xf32, #tpu.memory_space<vmem>>, vector<128x128xf32>
    %cst = arith.constant dense<0.000000e+00> : vector<8x128xf32>
    %11 = tpu.matmul %6, %10, %cst {dimension_numbers = #tpu.dot_dimension_numbers<[1], [0], [0], [1], [0, 0, 1, 1], [], []>} : vector<8x128xf32>, vector<128x128xf32>, vector<8x128xf32> -> vector<8x128xf32>
    %12 = arith.addf %9, %11 : vector<8x128xf32>
    %c0_6 = arith.constant 0 : index
    %c0_7 = arith.constant 0 : index
    %13 = vector.load %arg9[%c0_6, %c0_7] : memref<8x128xf32, #tpu.memory_space<vmem>>, vector<8x128xf32>
    tpu.vector_store %arg9[%c0_6, %c0_7], %12 {strides = array<i32>} : memref<8x128xf32, #tpu.memory_space<vmem>>, vector<8x128xf32>,
    %c0_8 = arith.constant 0 : index
    %c0_9 = arith.constant 0 : index
    %14 = vector.load %arg10[%c0_8, %c0_9] : memref<8x128xf32, #tpu.memory_space<vmem>>, vector<8x128xf32>
    %15 = vector.broadcast %8 : vector<1x128xf32> to vector<8x128xf32>
    %16 = arith.mulf %6, %15 : vector<8x128xf32>
    %c0_10 = arith.constant 0 : index
    %c0_11 = arith.constant 0 : index
    %17 = vector.load %arg5[%c0_10, %c0_11] : memref<128x128xf32, #tpu.memory_space<vmem>>, vector<128x128xf32>
    %cst_12 = arith.constant dense<0.000000e+00> : vector<8x128xf32>
    %18 = tpu.matmul %16, %17, %cst_12 {dimension_numbers = #tpu.dot_dimension_numbers<[1], [0], [0], [1], [0, 0, 1, 1], [], []>} : vector<8x128xf32>, vector<128x128xf32>, vector<8x128xf32> -> vector<8x128xf32>
    %19 = arith.addf %14, %18 : vector<8x128xf32>
    %c0_13 = arith.constant 0 : index
    %c0_14 = arith.constant 0 : index
    %20 = vector.load %arg10[%c0_13, %c0_14] : memref<8x128xf32, #tpu.memory_space<vmem>>, vector<8x128xf32>
    tpu.vector_store %arg10[%c0_13, %c0_14], %19 {strides = array<i32>} : memref<8x128xf32, #tpu.memory_space<vmem>>, vector<8x128xf32>,
    %c1_i32 = arith.constant 1 : i32
    %21 = arith.cmpi eq, %arg1, %c1_i32 : i32
    %22 = arith.extui %21 : i1 to i32
    %c0_i32_15 = arith.constant 0 : i32
    %23 = arith.cmpi ne, %22, %c0_i32_15 : i32
    scf.if %23 {
      %c0_16 = arith.constant 0 : index
      %c0_17 = arith.constant 0 : index
      %24 = vector.load %arg9[%c0_16, %c0_17] : memref<8x128xf32, #tpu.memory_space<vmem>>, vector<8x128xf32>
      %c0_18 = arith.constant 0 : index
      %c0_19 = arith.constant 0 : index
      %25 = vector.load %arg10[%c0_18, %c0_19] : memref<8x128xf32, #tpu.memory_space<vmem>>, vector<8x128xf32>
      %c0_20 = arith.constant 0 : index
      %c0_21 = arith.constant 0 : index
      %26 = vector.load %arg6[%c0_20, %c0_21] : memref<1x128xf32, #tpu.memory_space<vmem>>, vector<1x128xf32>
      %27 = vector.broadcast %26 : vector<1x128xf32> to vector<8x128xf32>
      %28 = arith.mulf %25, %27 : vector<8x128xf32>
      %29 = arith.addf %24, %28 : vector<8x128xf32>
      %c0_22 = arith.constant 0 : index
      %c0_23 = arith.constant 0 : index
      %30 = vector.load %arg7[%c0_22, %c0_23] : memref<1x128xf32, #tpu.memory_space<vmem>>, vector<1x128xf32>
      %31 = vector.broadcast %30 : vector<1x128xf32> to vector<8x128xf32>
      %32 = arith.addf %29, %31 : vector<8x128xf32>
      %c0_24 = arith.constant 0 : index
      %c0_25 = arith.constant 0 : index
      %33 = vector.load %arg8[%c0_24, %c0_25] : memref<8x128xf32, #tpu.memory_space<vmem>>, vector<8x128xf32>
      tpu.vector_store %arg8[%c0_24, %c0_25], %32 {strides = array<i32>} : memref<8x128xf32, #tpu.memory_space<vmem>>, vector<8x128xf32>,
    } else {
    }
    return
  }
  func.func @transform_0(%arg0: i32, %arg1: i32) -> (i32, i32) {
    %c0_i32 = arith.constant 0 : i32
    %c0_i32_0 = arith.constant 0 : i32
    %c0_i32_1 = arith.constant 0 : i32
    return %c0_i32, %c0_i32_0 : i32, i32
  }
  func.func @transform_1(%arg0: i32, %arg1: i32) -> (i32, i32) {
    %c0_i32 = arith.constant 0 : i32
    %c0_i32_0 = arith.constant 0 : i32
    %c0_i32_1 = arith.constant 0 : i32
    return %c0_i32, %c0_i32_0 : i32, i32
  }
  func.func @transform_2(%arg0: i32, %arg1: i32) -> (i32, i32) {
    %c0_i32 = arith.constant 0 : i32
    return %arg1, %arg0 : i32, i32
  }
  func.func @transform_3(%arg0: i32, %arg1: i32) -> (i32, i32) {
    %c0_i32 = arith.constant 0 : i32
    return %arg1, %arg0 : i32, i32
  }
  func.func @transform_4(%arg0: i32, %arg1: i32) -> (i32, i32) {
    %c0_i32 = arith.constant 0 : i32
    %c0_i32_0 = arith.constant 0 : i32
    return %c0_i32, %arg0 : i32, i32
  }
  func.func @transform_5(%arg0: i32, %arg1: i32) -> (i32, i32) {
    %c0_i32 = arith.constant 0 : i32
    %c0_i32_0 = arith.constant 0 : i32
    return %c0_i32, %arg0 : i32, i32
  }
  func.func @transform_6(%arg0: i32, %arg1: i32) -> (i32, i32) {
    %c0_i32 = arith.constant 0 : i32
    %c0_i32_0 = arith.constant 0 : i32
    return %c0_i32, %arg0 : i32, i32
  }
}

</mosaic_0001>

<bundles_post_ra>
// kernel: tpu_custom_call.1
= control target key start
LH: loop header
LB: loop body
LE: loop exit
PB: predicated region body
PF: predicated region fallthrough
CT: control target
= control target key end

     0   :  { %s1414_s0 = inlined_call_operand.hbm [shape: f32[8,256], index: 0, kind: input, shape index: {}]   ;;  %s1415_s1 = inlined_call_operand.hbm [shape: f32[1,256], index: 1, kind: input, shape index: {}]   ;;  %s1416_s2 = inlined_call_operand.hbm [shape: f32[256,256], index: 2, kind: input, shape index: {}]   ;;  %s1417_s3 = inlined_call_operand.hbm [shape: f32[256,256], index: 3, kind: input, shape index: {}]   ;;  %s1418_s4 = inlined_call_operand.vmem [shape: f32[1,256], index: 4, kind: input, shape index: {}]   ;;  %s1419_s5 = inlined_call_operand.vmem [shape: f32[1,256], index: 5, kind: input, shape index: {}]   ;;  %s1420_s6 = inlined_call_operand.hbm [shape: f32[8,256], index: 6, kind: output, shape index: {}]  }
   0x1   :  { %1433 = sst [smem:[#allocation27_spill]] %s1414_s0 }
   0x2   :  { %1434 = sst [smem:[#allocation28_spill]] %s1416_s2 }
   0x3   :  { %1435 = sst [smem:[#allocation29_spill]] %s1419_s5 }
   0x4   :  { %1436 = sst [smem:[#allocation30_spill]] %s1420_s6 }
   0x5   :  { %11 = vsyncpa [#allocation5], 0 }
   0x6   :  { %12 = vsyncpa [#allocation8], 0 }
   0x7   :  { %13 = vsyncpa [#allocation6], 0 }
   0x8   :  { %15 = vsyncpa [#allocation6 + $0x1], 0  ;;  %s1121_s21 = smov 0   ;;  %s1123_s22 = smov 0  }
   0x9   :  { %s1125_s23 = smov 0   ;;  %s1127_s24 = smov 0  }
   0xa   :  { %s1129_s25 = smov 0   ;;  %s1131_s26 = smov 0  }
   0xb   :  { %s1133_s27 = smov 0   ;;  %s1135_s28 = smov 0  }
   0xc   :  { %s1137_s29 = smov 0   ;;  %s1139_s30 = smov 0  }
   0xd   :  { %s1141_s7 = smov 0  }
   0xe LB: > { %1437 = sst [smem:[#allocation16_spill]] %s1038_s21  ;;  %s1175_s8 = sadd.s32 4294967295, %s1078_s7   ;;  %s1078_s7 = sphi %s1141_s7, %s21_s7   ;;  %s1074_s30 = sphi %s1139_s30, %s1480_s30   ;;  %s1070_s29 = sphi %s1137_s29, %s1479_s29   ;;  %s1066_s28 = sphi %s1135_s28, %s1478_s28   ;;  %s1062_s27 = sphi %s1133_s27, %s1477_s27   ;;  %s1058_s26 = sphi %s1131_s26, %s1469_s26   ;;  %s1054_s25 = sphi %s1129_s25, %s1476_s25   ;;  %s1050_s24 = sphi %s1127_s24, %s1475_s24   ;;  %s1046_s23 = sphi %s1125_s23, %s1474_s23   ;;  %s1042_s22 = sphi %s1123_s22, %s1473_s22   ;;  %s1038_s21 = sphi %s1121_s21, %s1472_s21  }
   0xf   : > { %1438 = sst [smem:[#allocation17_spill]] %s1046_s23  ;;  %s664_s9 = sadd.s32 4294967294, %s1078_s7  }
  0x10   : > { %1439 = sst [smem:[#allocation18_spill]] %s1058_s26  ;;  %s30_s10 = sadd.s32 1, %s1070_s29 }
  0x11   : > { %1440 = sst [smem:[#allocation19_spill]] %s1062_s27  ;;  %s33_s11 = sadd.s32 1, %s1074_s30 }
  0x12   : > { %1441 = sst [smem:[#allocation20_spill]] %s1078_s7  ;;  %p31_p0 = scmp.ge.s32.totalorder %s30_s10, 2 }
  0x13   : > { %s84_s12 = sadd.s32 1, %s1058_s26  ;;  %p91_p1 = scmp.ne.s32.totalorder %s1058_s26, %s1054_s25 }
  0x14   : > { %p92_p2 = scmp.eq.s32.totalorder %s1078_s7, 0  ;;  %s1482_s10 = smov (%p31_p0, %s30_s10), 0 }
  0x15   : > { %1442 = sst [smem:[#allocation21_spill]] %s1482_s10  ;;  %s1484_s11 = smov (!%p31_p0, %s33_s11), %s1074_s30 }
  0x16   : > { %s79_s13 = ssub.s32 %s1070_s29, %s1482_s10  ;;  %p1189_p3 = por %p92_p2, %p91_p1 }
  0x17   : > { %p35_p4 = scmp.ge.s32.totalorder %s1484_s11, 2  ;;  %p97_p5 = scmp.ne.s32.totalorder %s1054_s25, %s1050_s24 }
  0x18   : > { %p98_p6 = scmp.eq.s32.totalorder %s1175_s8, 0  ;;  %s190_s15 = sadd.s32 1, %s1046_s23 }
  0x19   : > { %s1486_s11 = smov (%p35_p4, %s1484_s11), 0  ;;  %p200_p8 = scmp.ne.s32.totalorder %s1046_s23, %s1042_s22 }
  0x1a   : > { %1444 = sst [smem:[#allocation22_spill]] %s1486_s11  ;;  %p1200_p7 = por %p98_p6, %p97_p5 }
  0x1b   : > { %s80_s17 = ssub.s32 %s1074_s30, %s1486_s11  ;;  %p201_p9 = scmp.eq.s32.totalorder %s1175_s8, 3 }
  0x1c   : > { %s81_s18 = sor.u32 %s80_s17, %s79_s13  ;;  %p188_p10 = scmp.eq.s32.totalorder %s80_s17, 0 }
  0x1d   : > { %p82_p11 = scmp.eq.s32.totalorder %s81_s18, 0  ;;  %p1209_p12 = por %p201_p9, %p200_p8 }
  0x1e   : > { %s1214_s20 = scalar_select %p188_p10, %s1046_s23, %s190_s15  }
  0x1f   : > { %s1446_s19 = scalar_select %p1209_p12, 1, 0 }
  0x20   : > { %1448 = sst [smem:[#allocation24_spill]] %s1214_s20  ;;  %p206_p13 = scmp.ne.s32.totalorder %s1042_s22, %s1038_s21 }
  0x21   : > { %1447 = sst [smem:[#allocation23_spill]] %s1446_s19  ;;  %p207_p0 = scmp.eq.s32.totalorder %s664_s9, 3 }
  0x22   : > { %s1217_s24 = scalar_select %p82_p11, %s1058_s26, %s84_s12  }
  0x23   : > { %p665_p1 = scmp.ge.s32.totalorder %s1078_s7, 1  ;;  %p214_p2 = scmp.lt.s32.totalorder %s1078_s7, 5 }
  0x24   : > { %1449 = sst [smem:[#allocation25_spill]] %s1217_s24  ;;  %p1223_p4 = por %p207_p0, %p206_p13 }
  0x25   : > { %p1227_p5 = pnand %p665_p1, %p214_p2  ;;  %s1453_s0 = sld [smem:[#allocation27_spill]] }
  0x26   : > { %s1450_s13 = scalar_select %p1223_p4, 1, 0 }
  0x27   : > { %p707_p8 = pneg %p1227_p5  ;;  %s1080_s9 = smov [#allocation4]  }
  0x28   : > { %1451 = sst [smem:[#allocation26_spill]] %s1450_s13  ;;  %s228_s11 = sshll.u32 %s1080_s9, 4  ;;  %s229_s11 = int_to_ptr.vmem [resolvable:$true] %s228_s11 }
  0x29   : > { %p1238_p9 = pnand %p707_p8, %p98_p6  ;;  %p727_p10 = scmp.lt.s32.totalorder %s1078_s7, 4 }
  0x2a   : > { %s251_s24 = sand.u32 1, %s1078_s7   ;;  %s253_s20 = sand.u32 1, %s1058_s26  }
  0x2b   : > { %s226_s12 = sshll.u32 %s1453_s0, 4  ;;  %p1247_p11 = pnand %p727_p10, %p1189_p3  ;;  %s227_s12 = int_to_ptr.hbm [resolvable:$true] %s226_s12 }
  0x2c   : > { %710 = dma.hbm_to_vmem [thread:$0]  (!%p1238_p9), %s227_s12, 256, %s229_s11, [#allocation5]  }
  0x2d   : > { %s669_s18 = sshll.u32 %s253_s20, 7  ;;  %s691_s9 = sshll.u32 %s1070_s29, 5 }
  0x2e   : > { %s260_s0 = sadd.s32 %s1074_s30, %s691_s9  ;;  %s255_s13 = scalar_lea.vmem [#allocation9], %s669_s18 }
  0x2f   : > { %s672_s23 = sshll.u32 %s260_s0, 3  ;;  %s265_s21 = sshll.u32 %s255_s13, 4  ;;  %s266_s21 = int_to_ptr.vmem [resolvable:$true] %s265_s21 }
  0x30   : > { %s1456_s2 = sld [smem:[#allocation28_spill]]  ;;  %s238_s5 = sshll.u32 %s1415_s1, 4  ;;  %s239_s5 = int_to_ptr.hbm [resolvable:$true] %s238_s5 }
  0x31   : > { %s252_s11 = scalar_lea.sflag [#allocation5], %s251_s24  ;;  %s1081_s20 = smov 256  }
  0x32   : > { %s1082_s12 = smov 128   ;;  %s1083_s9 = smov 8  }
  0x33   : > { %s1084_s0 = smov [#allocation7]   ;;  %s279_s26 = scalar_lea.vmem [#allocation10], %s669_s18 }
  0x34   : > { %s240_s13 = sshll.u32 %s1084_s0, 4  ;;  %s289_s27 = sshll.u32 %s279_s26, 4  ;;  %s241_s13 = int_to_ptr.vmem [resolvable:$true] %s240_s13  ;;  %s290_s27 = int_to_ptr.vmem [resolvable:$true] %s289_s27 }
  0x35   : > { %713 = dma.hbm_to_vmem [thread:$0]  (!%p1238_p9), %s239_s5, 32, %s241_s13, [#allocation8]  }
  0x36   : > { %s262_s7 = scalar_lea.hbm %s1456_s2, %s672_s23  ;;  %313 = sbr.rel (%p1227_p5) target bundleno = 282 (0x11a), region = 44 }
  0x37   : > { %s263_s14 = sshll.u32 %s262_s7, 4  ;;  %s286_s7 = scalar_lea.hbm %s1417_s3, %s672_s23  ;;  %s264_s14 = int_to_ptr.hbm [resolvable:$true] %s263_s14 }
  0x38   : > { %717 = dma.hbm_to_vmem [thread:$0]  (!%p1247_p11), %s264_s14, 2048, %s266_s21, %s252_s11, %s1081_s20, %s1082_s12, %s1083_s9  }
  0x39   : > { %s287_s2 = sshll.u32 %s286_s7, 4  ;;  %s288_s2 = int_to_ptr.hbm [resolvable:$true] %s287_s2 }
  0x3a   : > { %720 = dma.hbm_to_vmem [thread:$0]  (!%p1247_p11), %s288_s2, 2048, %s290_s27, %s252_s11, %s1081_s20, %s1082_s12, %s1083_s9  }
  0x3b   : > { %1021 = dma.done.wait (%p98_p6), [#allocation5], 256  }
  0x3c   : > { %1023 = vsyncadd (%p98_p6), [#allocation5], 4294967040 }
  0x3d   : > { %1025 = dma.done.wait (%p98_p6), [#allocation8], 32  }
  0x3e   : > { %1027 = vsyncadd (%p98_p6), [#allocation8], 4294967264  ;;  %s325_s5 = sand.u32 1, %s1175_s8   ;;  %s327_s2 = sand.u32 1, %s1054_s25  }
  0x3f   : > { %s680_s21 = sshll.u32 %s327_s2, 7  ;;  %s326_s23 = scalar_lea.sflag [#allocation5], %s325_s5 }
  0x40   : > { %s1282_s10 = scalar_lea.vmem [#allocation9], %s680_s21 }
  0x41   : > { %1029 = dma.done.wait (%p1200_p7), %s326_s23, 4096  }
  0x42   : > { %1031 = vsyncadd (%p1200_p7), %s326_s23, 4294963200  ;;  %s377_s24 = sand.u32 1, %s1042_s22   ;;  %p382_p3 = scmp.lt.s32.totalorder %s1066_s28, 1 }
  0x43   : > { %s1291_s17 = sshll.u32 %s377_s24, 3  ;;  %s1457_s20 = sld [smem:[#allocation29_spill]] }
  0x44   : > { %s1295_s8 = scalar_select %p382_p3, %s1066_s28, 1 }
  0x45   : > { %s1305_s9 = scalar_lea.vmem [#allocation10], %s680_s21  ;;  %s379_s0 = scalar_lea.vmem [#allocation11], %s1291_s17 }
  0x46   : > { %s384_s14 = scalar_lea.vmem %s1418_s4, %s1295_s8  ;;  %s1458_s13 = sld [smem:[#allocation19_spill]] }
  0x49   : > { %s387_s12 = scalar_lea.vmem %s1457_s20, %s1295_s8 }
  0x4c   : > { %p683_p6 = scmp.ne.s32.totalorder %s1458_s13, 0 }
  0x4e   : > { %391 = sbr.rel (%p683_p6) target bundleno = 86 (0x56), region = 64 }
  0x53   : > { %v1085_v0 = vmov 0.0  }
  0x54   : > { %392 = vst [vmem:[#allocation2] sm:$0xff] %v1085_v0 }
  0x55   : > { %393 = vst [vmem:[#allocation3] sm:$0xff] %v1085_v0 }
  0x56 PF: > { %s1459_s6 = sld [smem:[#allocation19_spill]]  ;;  %v418_v1 = vld [vmem:[%s1282_s10 + $0x78] sm:$0xff]  ;;  %v417_v3 = vld [vmem:[%s1282_s10 + $0x70] sm:$0xff]  ;;  %v416_v5 = vld [vmem:[%s1282_s10 + $0x68] sm:$0xff] }
  0x57   : > { %v461_v2 = vld [vmem:[%s1305_s9 + $0x78] sm:$0xff]  ;;  %419 = vmatpush.msra.mxu0 %v418_v1  ;;  %v460_v4 = vld [vmem:[%s1305_s9 + $0x70] sm:$0xff]  ;;  %v459_v6 = vld [vmem:[%s1305_s9 + $0x68] sm:$0xff] }
  0x58   : > { %462 = vmatpush.msra.mxu1 %v461_v2  ;;  %v415_v7 = vld [vmem:[%s1282_s10 + $0x60] sm:$0xff]  ;;  %v414_v9 = vld [vmem:[%s1282_s10 + $0x58] sm:$0xff]  ;;  %v413_v11 = vld [vmem:[%s1282_s10 + $0x50] sm:$0xff] }
  0x59   : > { %420 = vmatpush.msra.mxu0 %v417_v3  ;;  %v458_v8 = vld [vmem:[%s1305_s9 + $0x60] sm:$0xff]  ;;  %v457_v10 = vld [vmem:[%s1305_s9 + $0x58] sm:$0xff]  ;;  %v456_v12 = vld [vmem:[%s1305_s9 + $0x50] sm:$0xff] }
  0x5a   : > { %463 = vmatpush.msra.mxu1 %v460_v4  ;;  %v412_v13 = vld [vmem:[%s1282_s10 + $0x48] sm:$0xff]  ;;  %v411_v15 = vld [vmem:[%s1282_s10 + $0x40] sm:$0xff]  ;;  %v410_v17 = vld [vmem:[%s1282_s10 + $0x38] sm:$0xff] }
  0x5b   : > { %421 = vmatpush.msra.mxu0 %v416_v5  ;;  %v455_v14 = vld [vmem:[%s1305_s9 + $0x48] sm:$0xff]  ;;  %v454_v16 = vld [vmem:[%s1305_s9 + $0x40] sm:$0xff]  ;;  %v453_v18 = vld [vmem:[%s1305_s9 + $0x38] sm:$0xff] }
  0x5c   : > { %s684_s19 = sshll.u32 %s1459_s6, 7  ;;  %464 = vmatpush.msra.mxu1 %v459_v6  ;;  %v409_v19 = vld [vmem:[%s1282_s10 + $0x30] sm:$0xff]  ;;  %v408_v21 = vld [vmem:[%s1282_s10 + $0x28] sm:$0xff]  ;;  %v407_v23 = vld [vmem:[%s1282_s10 + $0x20] sm:$0xff]  ;;  %p686_p7 = scmp.ne.s32.totalorder %s1459_s6, 1 }
  0x5d   : > { %422 = vmatpush.msra.mxu0 %v415_v7  ;;  %s1320_s7 = sshra.s32 %s684_s19, 7  ;;  %v452_v20 = vld [vmem:[%s1305_s9 + $0x30] sm:$0xff]  ;;  %v451_v22 = vld [vmem:[%s1305_s9 + $0x28] sm:$0xff]  ;;  %v450_v24 = vld [vmem:[%s1305_s9 + $0x20] sm:$0xff] }
  0x5e   : > { %465 = vmatpush.msra.mxu1 %v458_v8  ;;  %s400_s26 = scalar_lea.vmem [#allocation7], %s1320_s7  ;;  %s685_s27 = sshll.u32 %s1320_s7, 3  ;;  %v406_v25 = vld [vmem:[%s1282_s10 + $0x18] sm:$0xff]  ;;  %v405_v27 = vld [vmem:[%s1282_s10 + $0x10] sm:$0xff]  ;;  %v404_v31 = vld [vmem:[%s1282_s10 + $0x8] sm:$0xff] }
  0x5f   : > { %423 = vmatpush.msra.mxu0 %v414_v9  ;;  %v449_v26 = vld [vmem:[%s1305_s9 + $0x18] sm:$0xff]  ;;  %v448_v28 = vld [vmem:[%s1305_s9 + $0x10] sm:$0xff]  ;;  %s398_s5 = scalar_lea.vmem [#allocation4], %s685_s27  ;;  %v447_v32 = vld [vmem:[%s1305_s9 + $0x8] sm:$0xff] }
  0x60   : > { %466 = vmatpush.msra.mxu1 %v457_v10  ;;  %v825_v29 = vld [vmem:[%s400_s26] ss:$0 sm:$0xff]  ;;  %v403_v33 = vld [vmem:[%s1282_s10] sm:$0xff] }
  0x61   : > { %424 = vmatpush.msra.mxu0 %v413_v11  ;;  %v399_v30 = vld [vmem:[%s398_s5] sm:$0xff]  ;;  %v441_v37 = vld [vmem:[#allocation3] sm:$0xff] }
  0x62   : > { %467 = vmatpush.msra.mxu1 %v456_v12  ;;  %v446_v34 = vld [vmem:[%s1305_s9] sm:$0xff]  ;;  %v445_v35 = vmul.f32 %v825_v29, %v399_v30 }
  0x63   : > { %425 = vmatpush.msra.mxu0 %v412_v13  ;;  %v402_v36 = vld [vmem:[#allocation2] sm:$0xff] }
  0x64   : > { %468 = vmatpush.msra.mxu1 %v455_v14 }
  0x65   : > { %426 = vmatpush.msra.mxu0 %v411_v15 }
  0x66   : > { %469 = vmatpush.msra.mxu1 %v454_v16 }
  0x67   : > { %427 = vmatpush.msra.mxu0 %v410_v17 }
  0x68   : > { %470 = vmatpush.msra.mxu1 %v453_v18 }
  0x69   : > { %428 = vmatpush.msra.mxu0 %v409_v19 }
  0x6a   : > { %471 = vmatpush.msra.mxu1 %v452_v20 }
  0x6b   : > { %429 = vmatpush.msra.mxu0 %v408_v21 }
  0x6c   : > { %472 = vmatpush.msra.mxu1 %v451_v22 }
  0x6d   : > { %430 = vmatpush.msra.mxu0 %v407_v23 }
  0x6e   : > { %473 = vmatpush.msra.mxu1 %v450_v24 }
  0x6f   : > { %431 = vmatpush.msra.mxu0 %v406_v25 }
  0x70   : > { %474 = vmatpush.msra.mxu1 %v449_v26 }
  0x71   : > { %432 = vmatpush.msra.mxu0 %v405_v27 }
  0x72   : > { %475 = vmatpush.msra.mxu1 %v448_v28 }
  0x73   : > { %433 = vmatpush.msra.mxu0 %v404_v31 }
  0x74   : > { %476 = vmatpush.msra.mxu1 %v447_v32 }
  0x75   : > { %434 = vmatpush.msra.mxu0 %v403_v33 }
  0x76   : > { %477 = vmatpush.msra.mxu1 %v446_v34  ;;  %435 = vmatmul.f32.vlgmr.msra.gmra.mxu0 %v399_v30 }
  0x77   : > { %478 = vmatmul.f32.vlgmr.msra.gmra.mxu1 %v445_v35 }
  0xf3   : > { %v436_v38 = vpop.f32.mrf.mxu0  ;;  %487 = sbr.rel (%p686_p7) target bundleno = 262 (0x106), region = 68 }
  0xf4   : > { %v479_v39 = vpop.f32.mrf.mxu1  ;;  %v439_v40 = vadd.f32 %v436_v38, %v402_v36 }
  0xf5   : > { %v482_v41 = vadd.f32 %v479_v39, %v441_v37 }
  0xf6   : > { %440 = vst [vmem:[#allocation2] sm:$0xff] %v439_v40 }
  0xf7   : > { %483 = vst [vmem:[#allocation3] sm:$0xff] %v482_v41 }
  0xf8   : > { %v826_v43 = vld [vmem:[%s384_s14] ss:$0 sm:$0xff] }
  0xf9   : > { %v827_v46 = vld [vmem:[%s387_s12] ss:$0 sm:$0xff] }
  0xfd   : > { %v488_v44 = vld [vmem:[#allocation2] sm:$0xff] }
  0xfe   : > { %v489_v42 = vld [vmem:[#allocation3] sm:$0xff] }
  0xff   : > { %v494_v45 = vmul.f32 %v826_v43, %v489_v42 }
 0x101   : > { %v495_v47 = vadd.f32 %v494_v45, %v488_v44 }
 0x103   : > { %v500_v48 = vadd.f32 %v827_v46, %v495_v47 }
 0x105   : > { %501 = vst [vmem:[%s379_s0] sm:$0xff] %v500_v48 }
 0x106 PF: > { %s688_s16 = sshll.u32 %s1066_s28, 3  ;;  %s1462_s14 = sld [smem:[#allocation30_spill]] }
 0x107   : > { %s515_s13 = sshll.u32 %s379_s0, 4  ;;  %s503_s8 = scalar_lea.sflag [#allocation6], %s377_s24  ;;  %s516_s13 = int_to_ptr.vmem [resolvable:$true] %s515_s13 }
 0x10c   : > { %s513_s9 = scalar_lea.hbm %s1462_s14, %s688_s16  ;;  %s968_s26 = scalar_lea.hbm %s1462_s14, 16 }
 0x10d   : > { %s517_s6 = sshll.u32 %s513_s9, 4  ;;  %s518_s6 = int_to_ptr.hbm [resolvable:$true] %s517_s6 }
 0x10e   : > { %s962_s12 = sshra.s32 %s518_s6, 4  ;;  %s963_s12 = int_to_ptr.hbm [resolvable:$true] %s962_s12 }
 0x10f   : > { %s964_s19 = scalar_lea.hbm %s963_s12, 8  ;;  %p969_p2 = scmp.lt.s32.totalorder %s963_s12, %s1462_s14 }
 0x110   : > { %p965_p13 = scmp.ne.s32.totalorder %s963_s12, %s964_s19  ;;  %p970_p5 = scmp.lt.s32.totalorder %s968_s26, %s964_s19 }
 0x112   : > { %p966_p0 = pnand %p965_p13, %p1209_p12  ;;  %p971_p8 = por %p970_p5, %p969_p2 }
 0x114   : > { %p967_p1 = pneg %p966_p0 }
 0x116   : > { %p972_p9 = pnand %p971_p8, %p967_p1 }
 0x118   : > { %975 = shalt.err (!%p972_p9)
}
 0x119   : > { %705 = dma.vmem_to_hbm [thread:$0]  (%p1209_p12), %s516_s13, 128, %s518_s6, %s503_s8  }
 0x11a PF: > { %s1463_s24 = sld [smem:[#allocation20_spill]] }
 0x11b   : > { %s1464_s17 = sld [smem:[#allocation16_spill]] }
 0x120   : > { %p730_p10 = scmp.ge.s32.totalorder %s1463_s24, 2 }
 0x121   : > { %s529_s2 = sand.u32 1, %s1464_s17  }
 0x122   : > { %p722_p11 = pnand %p730_p10, %p1223_p4  ;;  %s530_s21 = scalar_lea.sflag [#allocation6], %s529_s2 }
 0x124   : > { %p723_p3 = pneg %p722_p11 }
 0x126   : > { %1033 = dma.done.wait (%p723_p3), %s530_s21, 128  }
 0x127   : > { %1035 = vsyncadd (%p723_p3), %s530_s21, 4294967168  ;;  %s21_s7 = sadd.s32 1, %s1463_s24   ;;  %s1466_s23 = sld [smem:[#allocation17_spill]] }
 0x128   : > { %p18_p6 = scmp.ge.s32.totalorder %s21_s7, 6   ;;  %s1467_s10 = sld [smem:[#allocation24_spill]] }
 0x129   : > { %s1468_s15 = sld [smem:[#allocation18_spill]]  ;;  %s1472_s21 = smov %s1042_s22 }
 0x12a   : > { %s1469_s26 = sld [smem:[#allocation25_spill]]  ;;  %s1475_s24 = smov %s1054_s25 }
 0x12b   : > { %s1470_s18 = sld [smem:[#allocation21_spill]]  ;;  %s1477_s27 = smov %s1070_s29 }
 0x12c   : > { %s1471_s16 = sld [smem:[#allocation22_spill]]  ;;  %s1478_s28 = smov %s1074_s30 }
 0x12d   : > { %s1473_s22 = smov %s1466_s23 }
 0x12e   : > { %s1474_s23 = smov %s1467_s10  ;;  %20 = sbr.rel (!%p18_p6) target bundleno = 14 (0xe), region = 123 }
 0x12f   : > { %s1476_s25 = smov %s1468_s15 }
 0x131   : > { %s1479_s29 = smov %s1470_s18 }
 0x132   : > { %s1480_s30 = smov %s1471_s16 }
 0x133   :  { %536 = vsyncpa [#allocation5], 1 }
 0x134   :  { %538 = vsyncpa [#allocation5 + $0x1], 1 }
 0x135   :  { %539 = vsyncpa [#allocation8], 1 }
 0x136   :  { %540 = vsyncpa [#allocation6], 1 }
 0x137   :  { %542 = vsyncpa [#allocation6 + $0x1], 1 }

</bundles_post_ra>
